<compile_context>
chip_gen: v7x
topology: tpu7x:2x2x1
jax: 0.10.0
libtpu: 0.0.40
codegen_flags: <defaults>
</compile_context>

<pallas_src>
import functools

import jax
import jax.numpy as jnp
from jax.experimental import pallas as pl
from jax.experimental.pallas import tpu as pltpu


def _rmsnorm_kernel(x_ref, w_ref, o_ref, *, eps):
    # x_ref: (block_rows, hidden), w_ref: (1, hidden)
    x = x_ref[...].astype(jnp.float32)
    w = w_ref[...].astype(jnp.float32)            # broadcasts over rows
    ms = jnp.mean(x * x, axis=-1, keepdims=True)  # per-row mean of squares (XLU)
    inv = jax.lax.rsqrt(ms + eps)                 # EUP
    o_ref[...] = (x * inv * w).astype(o_ref.dtype)


def _rms_norm_xla(x, weight, eps):
    """Pure-JAX fallback for tiny inputs (pallas_call overhead dominates)."""
    xf = x.astype(jnp.float32)
    inv = jax.lax.rsqrt(jnp.mean(xf * xf, axis=-1, keepdims=True) + eps)
    return (xf * inv * weight.astype(jnp.float32)).astype(x.dtype)


@functools.lru_cache(maxsize=None)
def _chip_config():
    """Returns (num_tensorcores, target_block_bytes, vmem_limit_cap_bytes)."""
    kind = ""
    try:
        kind = jax.devices()[0].device_kind.lower()
    except Exception:
        pass
    vmem_cap = None
    try:
        vmem_cap = int(pltpu.get_tpu_info().vmem_capacity_bytes)
    except Exception:
        pass

    is_v7 = ("v7" in kind) or (vmem_cap is not None and 0 < vmem_cap <= (80 << 20))
    if is_v7:
        # v7x: 2 TCs/chip, 64 MiB VMEM/TC, ~3.2 TB/s HBM.  Bigger blocks are
        # needed to amortize the ~0.35us per-grid-step overhead; keep the
        # double-buffered in/out blocks + f32 temps under ~56 MiB.
        n_cores = 2 if "v7" in kind else 1  # only trust core count from device_kind
        return n_cores, 10 << 20, 56 << 20
    if vmem_cap is not None and vmem_cap >= (100 << 20):
        # v5e/v6e: 128 MiB physical VMEM -> allow up to ~96 MiB so very wide
        # hidden (>=16-32K f32) keeps block_rows out of the per-step-overhead
        # regime on chips that actually have the headroom.
        return 1, 4 << 20, 96 << 20
    # Unknown chip / no info: conservative, safe everywhere.
    return 1, 4 << 20, 48 << 20


def _choose_block_rows(rows, hidden, itemsize, *, target_block_bytes,
                       vmem_budget_bytes, num_cores, sublane):
    """Pick a row tile: large enough to hide the per-grid-step pipeline
    overhead (chip-dependent HBM-bytes target), small enough that the
    double-buffered in+out blocks plus the f32 upcast temporaries stay inside
    the VMEM budget.  Rounded to the dtype's packed sublane tile."""
    row_io = hidden * itemsize            # HBM bytes per row (input block)
    row_f32 = hidden * 4                  # f32 working bytes per row
    # Per-row VMEM cost: 2x-buffered in + out blocks (x.dtype) + ~3 live f32 temps.
    row_vmem = 4 * row_io + 3 * row_f32

    br = target_block_bytes // max(1, row_io)
    br = min(br, max(1, (vmem_budget_bytes - 4 * row_f32) // max(1, row_vmem)))
    br = max(sublane, (br // sublane) * sublane)

    if num_cores > 1:
        # Keep >= 2 pipelined steps per TensorCore so each core's input DMA /
        # output writeback overlaps with compute (skip for tiny problems).
        min_steps = 2 * num_cores
        if rows > sublane * min_steps:
            per_step = -(-rows // min_steps)
            per_step = -(-per_step // sublane) * sublane
            br = min(br, max(sublane, per_step))

    # Never larger than the (sublane-rounded) problem itself.
    br = min(br, -(-rows // sublane) * sublane)
    return int(max(sublane, br))


def fused_rms_norm(x, weight, eps=1e-5, block_rows=None, allow_xla_fallback=True):
    """RMSNorm over the last axis of x, matching FusedRMSNorm.forward semantics."""
    orig_shape = x.shape
    hidden = orig_shape[-1]
    assert weight.shape == (hidden,)

    x2 = x.reshape(-1, hidden)
    rows = x2.shape[0]
    itemsize = x2.dtype.itemsize

    # Tiny inputs: pallas_call fixed overhead dominates; let XLA fuse it.
    if allow_xla_fallback and rows * hidden * itemsize < (256 << 10):
        return _rms_norm_xla(x, weight, eps).reshape(orig_shape)

    n_cores, target_block_bytes, vmem_limit_cap = _chip_config()

    # Sub-32-bit dtypes pack along sublanes: 8 rows (f32), 16 (bf16), 32 (int8).
    sublane = 8 * max(1, 4 // max(1, itemsize))

    if block_rows is None:
        block_rows = _choose_block_rows(
            rows, hidden, itemsize,
            target_block_bytes=target_block_bytes,
            vmem_budget_bytes=(vmem_limit_cap * 7) // 8,
            num_cores=n_cores, sublane=sublane)

    # TODO(synk): for very large hidden (>=16K f32) add a second grid axis over
    # hidden chunks with a sum-of-squares accumulator ("arbitrary" axis)
    # instead of shrinking block_rows toward the per-step-overhead regime.

    steps = pl.cdiv(rows, block_rows)   # remainder block is masked, no padding copy
    grid = (steps,)
    w2 = weight.reshape(1, hidden)

    # Plain "parallel" barely changes codegen; only core-parallel semantics
    # reliably shard the row loop across v7x's 2 TensorCores.
    if n_cores > 1 and steps >= 2 * n_cores:
        row_sem = getattr(pltpu, "CORE_PARALLEL", "parallel")
    else:
        row_sem = "parallel"

    # VMEM request: double-buffered in + out blocks (x.dtype) + ~3 live f32
    # temporaries from the upcast + weight buffers, with headroom; capped per
    # chip (56 MiB on v7x's 64 MiB VMEM, 96 MiB on 128 MiB chips).
    blk_io = block_rows * hidden * itemsize
    blk_f32 = block_rows * hidden * 4
    est = 2 * 2 * blk_io + 3 * blk_f32 + 4 * hidden * 4
    vmem_limit = int(min(vmem_limit_cap, max(est * 3 // 2, 16 << 20)))

    # NOTE: with >=2 steps per core the first-step DMA is already overlapped,
    # so pipeline_mode=pl.Buffered(3) on the x input is intentionally not used.
    out = pl.pallas_call(
        functools.partial(_rmsnorm_kernel, eps=eps),
        out_shape=jax.ShapeDtypeStruct((rows, hidden), x.dtype),
        grid_spec=pltpu.PrefetchScalarGridSpec(
            num_scalar_prefetch=0,
            grid=grid,
            in_specs=[
                pl.BlockSpec((block_rows, hidden), lambda i: (i, 0)),
                # Constant block index -> fetched once, not re-DMA'd per step.
                pl.BlockSpec((1, hidden), lambda i: (0, 0)),
            ],
            out_specs=pl.BlockSpec((block_rows, hidden), lambda i: (i, 0)),
        ),
        compiler_params=pltpu.CompilerParams(
            dimension_semantics=(row_sem,),
            vmem_limit_bytes=vmem_limit,
        ),
    )(x2, w2)

    return out.reshape(orig_shape)


if __name__ == "__main__":
    key = jax.random.PRNGKey(0)
    k0, k1 = jax.random.split(key)

    batch, seq, hidden = 2, 8, 32
    x = jax.random.normal(k0, (batch, seq, hidden), dtype=jnp.float32)

    # FusedRMSNorm.__init__: weight = ones(size)
    weight = jnp.ones((hidden,), dtype=jnp.float32)
    eps = 1e-5

    def ref_fn(xx):
        return xx * jax.lax.rsqrt(jnp.mean(xx * xx, axis=-1, keepdims=True) + eps) * weight

    # Force the Pallas path (by default this tiny input would route to XLA).
    y = fused_rms_norm(x, weight, eps, allow_xla_fallback=False)
    y = jax.block_until_ready(y)
    ref = ref_fn(x)
    assert y.shape == x.shape and y.dtype == x.dtype
    assert jnp.allclose(y, ref, atol=1e-5, rtol=1e-5)

    # Remainder path: rows (=15) not a multiple of the row tile -> masked
    # boundary block, no padded copy on the HBM hot path.
    x3 = jax.random.normal(k1, (3, 5, hidden), dtype=jnp.float32)
    y3 = jax.block_until_ready(fused_rms_norm(x3, weight, eps, allow_xla_fallback=False))
    ref3 = ref_fn(x3)
    assert y3.shape == x3.shape and y3.dtype == x3.dtype
    assert jnp.allclose(y3, ref3, atol=1e-5, rtol=1e-5)

    # Default entry point (tiny input -> XLA fallback) matches too.
    y_d = jax.block_until_ready(fused_rms_norm(x, weight, eps))
    assert jnp.allclose(y_d, ref, atol=1e-5, rtol=1e-5)

    print("KERNEL_OK")
</pallas_src>

<mosaic_0001>
module attributes {stable_mosaic.version = 11 : i64} {
  func.func @_rmsnorm_kernel(%arg0: i32, %arg1: memref<16x32xf32, #tpu.memory_space<vmem>>, %arg2: memref<1x32xf32, #tpu.memory_space<vmem>>, %arg3: memref<16x32xf32, #tpu.memory_space<vmem>>) attributes {dimension_semantics = [#tpu.dimension_semantics<parallel>], iteration_bounds = array<i64: 1>, scalar_prefetch = 0 : i64, scratch_operands = 0 : i64, tpu.core_type = #tpu.core_type<tc>, window_params = [{transform_indices = @transform_0, window_bounds = array<i64: 16, 32>}, {pipeline_mode = #tpu.pipeline_mode<synchronous>, transform_indices = @transform_1, window_bounds = array<i64: 1, 32>}, {transform_indices = @transform_2, window_bounds = array<i64: 16, 32>}]} {
    %c0 = arith.constant 0 : index
    %c0_0 = arith.constant 0 : index
    %0 = vector.load %arg1[%c0, %c0_0] : memref<16x32xf32, #tpu.memory_space<vmem>>, vector<16x32xf32>
    %c0_1 = arith.constant 0 : index
    %c0_2 = arith.constant 0 : index
    %1 = vector.load %arg2[%c0_1, %c0_2] : memref<1x32xf32, #tpu.memory_space<vmem>>, vector<1x32xf32>
    %2 = arith.mulf %0, %0 : vector<16x32xf32>
    %cst = arith.constant dense<0.000000e+00> : vector<16xf32>
    %3 = vector.multi_reduction <add>, %2, %cst [1] : vector<16x32xf32> to vector<16xf32>
    %4 = vector.shape_cast %3 : vector<16xf32> to vector<16x1xf32>
    %cst_3 = arith.constant 3.200000e+01 : f32
    %5 = vector.broadcast %cst_3 : f32 to vector<16x1xf32>
    %6 = arith.divf %4, %5 : vector<16x1xf32>
    %cst_4 = arith.constant 9.99999974E-6 : f32
    %7 = vector.broadcast %cst_4 : f32 to vector<16x1xf32>
    %8 = arith.addf %6, %7 : vector<16x1xf32>
    %9 = math.rsqrt %8 : vector<16x1xf32>
    %10 = vector.broadcast %9 : vector<16x1xf32> to vector<16x32xf32>
    %11 = arith.mulf %0, %10 : vector<16x32xf32>
    %12 = vector.broadcast %1 : vector<1x32xf32> to vector<16x32xf32>
    %13 = arith.mulf %11, %12 : vector<16x32xf32>
    %c0_5 = arith.constant 0 : index
    %c0_6 = arith.constant 0 : index
    %14 = vector.load %arg3[%c0_5, %c0_6] : memref<16x32xf32, #tpu.memory_space<vmem>>, vector<16x32xf32>
    tpu.vector_store %arg3[%c0_5, %c0_6], %13 {strides = array<i32>} : memref<16x32xf32, #tpu.memory_space<vmem>>, vector<16x32xf32>,
    return
  }
  func.func @transform_0(%arg0: i32) -> (i32, i32) {
    %c0_i32 = arith.constant 0 : i32
    %c0_i32_0 = arith.constant 0 : i32
    return %arg0, %c0_i32 : i32, i32
  }
  func.func @transform_1(%arg0: i32) -> (i32, i32) {
    %c0_i32 = arith.constant 0 : i32
    %c0_i32_0 = arith.constant 0 : i32
    %c0_i32_1 = arith.constant 0 : i32
    return %c0_i32, %c0_i32_0 : i32, i32
  }
  func.func @transform_2(%arg0: i32) -> (i32, i32) {
    %c0_i32 = arith.constant 0 : i32
    %c0_i32_0 = arith.constant 0 : i32
    return %arg0, %c0_i32 : i32, i32
  }
}

</mosaic_0001>

<bundles_post_ra>
// kernel: tpu_custom_call.1
= control target key start
LH: loop header
LB: loop body
LE: loop exit
PB: predicated region body
PF: predicated region fallthrough
CT: control target
= control target key end

     0   :  { %7 = vsyncpa [#allocation3], 0  ;;  %s187_s0 = inlined_call_operand.hbm [shape: f32[16,32], index: 0, kind: input, shape index: {}]   ;;  %s188_s1 = inlined_call_operand.vmem [shape: f32[1,32], index: 1, kind: input, shape index: {}]   ;;  %s189_s2 = inlined_call_operand.hbm [shape: f32[16,32], index: 2, kind: output, shape index: {}]  }
   0x1   :  { %8 = vsyncpa [#allocation4], 0  ;;  %s131_s9 = smov [#allocation2]   ;;  %s83_s13 = scalar_lea.hbm %s187_s0, 256 }
   0x2   :  { %s14_s10 = sshll.u32 %s131_s9, 4  ;;  %p84_p0 = scmp.ne.s32.totalorder %s187_s0, %s83_s13  ;;  %s15_s10 = int_to_ptr.vmem [resolvable:$true] %s14_s10 }
   0x3   :  { %p87_p1 = scmp.lt.u32.totalorder %s83_s13, %s187_s0 }
   0x5   :  { %p89_p2 = pnand %p87_p1, %p84_p0 }
   0x7   :  { %92 = shalt.err (!%p89_p2)
}
   0x8   :  { %s93_s18 = scalar_lea.vmem %s15_s10, 256  ;;  %p98_p4 = scmp.lt.s32.totalorder %s15_s10, %s15_s10 }
   0x9   :  { %p94_p3 = scmp.ne.s32.totalorder %s15_s10, %s93_s18  ;;  %p99_p5 = scmp.lt.s32.totalorder %s93_s18, %s93_s18 }
   0xb   :  { %p100_p6 = por %p99_p5, %p98_p4 }
   0xd   :  { %p101_p7 = pnand %p100_p6, %p94_p3 }
   0xf   :  { %104 = shalt.err (!%p101_p7)
}
  0x10   :  { %s132_s19 = smov 128   ;;  %s133_s20 = smov 8  }
  0x11   :  { %20 = dma.hbm_to_vmem [thread:$0]  %s187_s0, 256, %s15_s10, [#allocation3], %s132_s19, %s132_s19, %s133_s20  }
  0x12   :  { %127 = dma.done.wait [#allocation3], 256  }
  0x13   :  { %128 = vsyncadd [#allocation3], 4294967040  ;;  %v26_v0 = vld [vmem:[#allocation2] sm:$0xff]  ;;  %vm31_vm0 = vcmask 261120   ;;  %v27_v1 = vld [vmem:[#allocation2 + $0x8] sm:$0xff]  ;;  %s134_s24 = smov [#allocation5]  }
  0x14   :  { %v29_v2 = vmul.f32 %v26_v0, %v26_v0  ;;  %v30_v3 = vmul.f32 %v27_v1, %v27_v1  ;;  %v74_v13 = vld [vmem:[%s188_s1] ss:$0 sm:$0xff]  ;;  %s62_s25 = sshll.u32 %s134_s24, 4  ;;  %s63_s25 = int_to_ptr.vmem [resolvable:$true] %s62_s25 }
  0x15   :  { %s105_s26 = scalar_lea.vmem %s63_s25, 256  ;;  %p110_p9 = scmp.lt.s32.totalorder %s63_s25, %s63_s25 }
  0x16   :  { %v32_v4 = vsel %vm31_vm0, %v29_v2, 0.0  ;;  %v35_v5 = vsel %vm31_vm0, %v30_v3, 0.0  ;;  %p106_p8 = scmp.ne.s32.totalorder %s63_s25, %s105_s26  ;;  %p111_p10 = scmp.lt.s32.totalorder %s105_s26, %s105_s26 }
  0x17   :  { %33 = vadd.xlane.f32.xlu0 %v32_v4 }
  0x18   :  { %p112_p11 = por %p111_p10, %p110_p9 }
  0x1a   :  { %p113_p12 = pnand %p112_p11, %p106_p8 }
  0x1b   :  { %36 = vadd.xlane.f32.xlu0 %v35_v5 }
  0xa4   :  { %v34_v6 = vpop.xlane.xlu0 %33 }
  0xa5   :  { %v39_v7 = vmul.f32 0.03125, %v34_v6 }
  0xa7   :  { %v41_v8 = vadd.f32 1e-05, %v39_v7 }
  0xa8   :  { %v37_v9 = vpop.xlane.xlu0 %36 }
  0xa9   :  { %79 = vrsqrt.f32 %v41_v8  ;;  %v40_v10 = vmul.f32 0.03125, %v37_v9 }
  0xab   :  { %v42_v11 = vadd.f32 1e-05, %v40_v10 }
  0xad   :  { %81 = vrsqrt.f32 %v42_v11 }
  0xb3   :  { %v80_v12 = vpop.eup %79 }
  0xb4   :  { %v45_v14 = vmul.f32 %v80_v12, %v26_v0 }
  0xb6   :  { %v53_v15 = vmul.f32 %v74_v13, %v45_v14 }
  0xb7   :  { %v82_v16 = vpop.eup %81 }
  0xb8   :  { %v46_v17 = vmul.f32 %v82_v16, %v27_v1  ;;  %55 = vst.msk [vmem:[#allocation5] sm:$0xff] %vm31_vm0, %v53_v15 }
  0xba   :  { %v54_v18 = vmul.f32 %v74_v13, %v46_v17 }
  0xbc   :  { %56 = vst.msk [vmem:[#allocation5 + $0x8] sm:$0xff] %vm31_vm0, %v54_v18 }
  0xbd   :  { %116 = shalt.err (!%p113_p12)
}
  0xbe   :  { %s117_s28 = scalar_lea.hbm %s189_s2, 256 }
  0xbf   :  { %p118_p13 = scmp.ne.s32.totalorder %s189_s2, %s117_s28  ;;  %p121_p0 = scmp.lt.u32.totalorder %s117_s28, %s189_s2 }
  0xc1   :  { %p123_p1 = pnand %p121_p0, %p118_p13 }
  0xc3   :  { %126 = shalt.err (!%p123_p1)
}
  0xc4   :  { %68 = dma.vmem_to_hbm [thread:$0]  %s63_s25, 256, %s189_s2, [#allocation4], %s132_s19, %s132_s19, %s133_s20  }
  0xc5   :  { %129 = dma.done.wait [#allocation4], 256  }
  0xc6   :  { %130 = vsyncadd [#allocation4], 4294967040 }
  0xc7   :  { %72 = vsyncpa [#allocation3], 1 }
  0xc8   :  { %73 = vsyncpa [#allocation4], 1 }

</bundles_post_ra>
